<compile_context>
chip_gen: v5e
topology: v5e:2x2
jax: 0.10.0
libtpu: 0.0.40
codegen_flags: <defaults>
</compile_context>

<pallas_src>
import functools

import jax
import jax.numpy as jnp
import numpy as np
from jax.experimental import pallas as pl
from jax.experimental.pallas import tpu as pltpu


def _round_up(x, m):
    return ((x + m - 1) // m) * m


def rnn_param_kernel(xh_ref, wxb_ref, whs_ref, wob_ref, out_ref, *,
                     n_hidden_layers, x_cols, hp, compute_dtype, approx_recip):
    """One batch tile of the full forward.

    xh_ref : (TB, x_cols + Hp)     [ x | 1 | 0pad | hidden ]   (compute dtype)
    wxb_ref: (x_cols, (L-1)*Hp)    per-layer [wx[i]; bh[i]; 0pad] slabs, side by side
    whs_ref: (L-1, Hp, Hp)         hidden-part of hidden-layer weights
    wob_ref: (Hp + 8, Op)          rows [0:Hp] = wo, row Hp = bo (padded cols = -1e30)
    out_ref: (TB, Hp + Op) f32     [:, :Hp] = final combined, [:, Hp:] = softmax
    """
    xh = xh_ref[...]
    x_ext = xh[:, :x_cols]                          # lane-aligned static slice
    combined = xh[:, x_cols:].astype(jnp.float32)   # initial "combined" = hidden

    # Hoisted: every layer's x @ wx[i] + bh[i] in a single wide MXU matmul
    # (bias folded in via the ones-column of x_ext and the bias row of wxb).
    xc = jnp.dot(x_ext, wxb_ref[...], preferred_element_type=jnp.float32)

    # Serial hidden chain: only one MXU op per layer now.
    # TODO(synk): switch to lax.fori_loop + pl.ds slices if num_layers grows large.
    for i in range(n_hidden_layers):
        combined = (
            jnp.dot(combined.astype(compute_dtype), whs_ref[i],
                    preferred_element_type=jnp.float32)
            + xc[:, i * hp:(i + 1) * hp]
        )

    # Output layer: weight rows [0:Hp], bias row at Hp.
    logits = (
        jnp.dot(combined.astype(compute_dtype), wob_ref[0:hp, :],
                preferred_element_type=jnp.float32)
        + wob_ref[hp:hp + 1, :].astype(jnp.float32)
    )

    # Numerically-stable softmax over dim=1 (padded columns carry -1e30 bias -> exp == 0).
    m = jnp.max(logits, axis=1, keepdims=True)
    e = jnp.exp(logits - m)
    s = jnp.sum(e, axis=1, keepdims=True)
    if approx_recip:
        probs = e * pl.reciprocal(s, approx=True)
    else:
        probs = e / s

    out_ref[:, :hp] = combined
    out_ref[:, hp:] = probs


@functools.partial(jax.jit, static_argnames=("compute_dtype",))
def rnn_parametrizer_forward(x, h, w_hid, b_hid, w_out, b_out, *,
                             compute_dtype=jnp.bfloat16):
    """Forward pass.

    x     : (B, I)           input
    h     : (B, H)           hidden state
    w_hid : (L-1, I+H, H)    hidden-layer weights, transposed vs nn.Linear.weight
    b_hid : (L-1, H)         hidden-layer biases
    w_out : (H, O)           output-layer weight (transposed)
    b_out : (O,)             output-layer bias
    Returns (softmax_output (B, O), combined (B, H)) in float32.
    """
    B, I = x.shape
    H = h.shape[1]
    L1 = w_hid.shape[0]
    O = w_out.shape[1]

    # ---- padded, lane/sublane-dense geometry --------------------------------
    if B <= 128:
        TB = _round_up(B, 8)
    else:
        TB = 128
    Bp = _round_up(B, TB)
    Hp = _round_up(H, 128)
    Op = _round_up(O, 128)
    Xc = _round_up(I + 1, 128)          # x columns + a ones-column for the bias

    f32 = jnp.float32
    wx = w_hid[:, :I, :]                # (L-1, I, H)  input part
    wh = w_hid[:, I:, :]                # (L-1, H, H)  hidden part

    # operand 1: [ x | 1 | 0 | hidden ]  -> one DMA for both activations
    xh = jnp.zeros((Bp, Xc + Hp), f32)
    xh = xh.at[:B, :I].set(x.astype(f32))
    xh = xh.at[:B, I].set(1.0)
    xh = xh.at[:B, Xc:Xc + H].set(h.astype(f32))
    xh = xh.astype(compute_dtype)

    # operand 2: per-layer [wx[i]; bh[i]; 0] slabs, laid side by side
    wxb3 = jnp.zeros((L1, Xc, Hp), f32)
    wxb3 = wxb3.at[:, :I, :H].set(wx)
    wxb3 = wxb3.at[:, I, :H].set(b_hid)
    wxb = jnp.transpose(wxb3, (1, 0, 2)).reshape(Xc, L1 * Hp).astype(compute_dtype)

    # operand 3: stacked hidden-part weights
    whs = jnp.zeros((L1, Hp, Hp), f32).at[:, :H, :H].set(wh).astype(compute_dtype)

    # operand 4: output weight with bias row; padded softmax columns masked out
    wob = jnp.zeros((Hp + 8, Op), f32)
    wob = wob.at[:H, :O].set(w_out)
    wob = wob.at[Hp, :O].set(b_out)
    if Op > O:
        wob = wob.at[Hp, O:].set(-1e30)
    wob = wob.astype(compute_dtype)

    itemsize = jnp.dtype(compute_dtype).itemsize
    in_bytes = (xh.size + wxb.size + whs.size + wob.size) * itemsize
    out_bytes = Bp * (Hp + Op) * 4
    vmem_limit = int(min(64 * 2**20,
                         max(16 * 2**20, 3 * in_bytes + 3 * out_bytes + (2 << 20))))

    cost = pl.CostEstimate(
        flops=2 * Bp * (Xc * L1 * Hp + L1 * Hp * Hp + Hp * Op),
        transcendentals=Bp * Op,
        bytes_accessed=in_bytes + out_bytes,
    )

    kernel = functools.partial(
        rnn_param_kernel,
        n_hidden_layers=L1, x_cols=Xc, hp=Hp,
        compute_dtype=compute_dtype,
        approx_recip=(jnp.dtype(compute_dtype) == jnp.dtype(jnp.bfloat16)),
    )

    out = pl.pallas_call(
        kernel,
        out_shape=jax.ShapeDtypeStruct((Bp, Hp + Op), jnp.float32),
        grid=(Bp // TB,),
        in_specs=[
            pl.BlockSpec((TB, Xc + Hp), lambda b: (b, 0)),
            pl.BlockSpec((Xc, L1 * Hp), lambda b: (0, 0)),
            pl.BlockSpec((L1, Hp, Hp), lambda b: (0, 0, 0)),
            pl.BlockSpec((Hp + 8, Op), lambda b: (0, 0)),
        ],
        out_specs=pl.BlockSpec((TB, Hp + Op), lambda b: (b, 0)),
        compiler_params=pltpu.CompilerParams(
            dimension_semantics=("parallel",),
            vmem_limit_bytes=vmem_limit,
        ),
        cost_estimate=cost,
    )(xh, wxb, whs, wob)

    return out[:B, Hp:Hp + O], out[:B, :H]


def init_params(key, input_size, hidden_size, output_size, num_layers):
    """nn.Linear-style U(-1/sqrt(fan_in), +1/sqrt(fan_in)) init; weights transposed."""
    n_hidden = num_layers - 1
    fan_in_h = input_size + hidden_size
    k_wh, k_bh, k_wo, k_bo = jax.random.split(key, 4)

    bh_bound = 1.0 / np.sqrt(fan_in_h)
    w_hid = jax.random.uniform(k_wh, (n_hidden, fan_in_h, hidden_size),
                               minval=-bh_bound, maxval=bh_bound, dtype=jnp.float32)
    b_hid = jax.random.uniform(k_bh, (n_hidden, hidden_size),
                               minval=-bh_bound, maxval=bh_bound, dtype=jnp.float32)

    bo_bound = 1.0 / np.sqrt(hidden_size)
    w_out = jax.random.uniform(k_wo, (hidden_size, output_size),
                               minval=-bo_bound, maxval=bo_bound, dtype=jnp.float32)
    b_out = jax.random.uniform(k_bo, (output_size,),
                               minval=-bo_bound, maxval=bo_bound, dtype=jnp.float32)
    return w_hid, b_hid, w_out, b_out


def ref_forward(x, h, w_hid, b_hid, w_out, b_out):
    """Pure-JAX reference (PyTorch forward semantics)."""
    combined = h
    for i in range(w_hid.shape[0]):
        combined = jnp.concatenate([x, combined], axis=1) @ w_hid[i] + b_hid[i]
    logits = combined @ w_out + b_out
    return jax.nn.softmax(logits, axis=1), combined


if __name__ == "__main__":
    batch, input_size, hidden_size, output_size, num_layers = 4, 16, 32, 8, 3

    key = jax.random.PRNGKey(0)
    k_x, k_h, k_p = jax.random.split(key, 3)
    x = jax.random.normal(k_x, (batch, input_size), dtype=jnp.float32)
    hidden = jax.random.normal(k_h, (batch, hidden_size), dtype=jnp.float32)
    w_hid, b_hid, w_out, b_out = init_params(k_p, input_size, hidden_size,
                                             output_size, num_layers)

    out_r, comb_r = ref_forward(x, hidden, w_hid, b_hid, w_out, b_out)

    # Exact (f32) path: must match the PyTorch-semantics reference tightly.
    out32, comb32 = rnn_parametrizer_forward(x, hidden, w_hid, b_hid, w_out, b_out,
                                             compute_dtype=jnp.float32)
    jax.block_until_ready((out32, comb32))
    np.testing.assert_allclose(np.asarray(out32), np.asarray(out_r),
                               rtol=1e-5, atol=1e-5)
    np.testing.assert_allclose(np.asarray(comb32), np.asarray(comb_r),
                               rtol=1e-5, atol=1e-5)

    # Fast path: bf16 MXU operands, f32 accumulation/softmax -> looser tolerance.
    out16, comb16 = rnn_parametrizer_forward(x, hidden, w_hid, b_hid, w_out, b_out,
                                             compute_dtype=jnp.bfloat16)
    jax.block_until_ready((out16, comb16))
    np.testing.assert_allclose(np.asarray(out16), np.asarray(out_r),
                               rtol=5e-2, atol=5e-2)
    np.testing.assert_allclose(np.asarray(comb16), np.asarray(comb_r),
                               rtol=5e-2, atol=5e-2)

    print("KERNEL_OK")
</pallas_src>

<mosaic_0001>
module attributes {stable_mosaic.version = 11 : i64} {
  func.func @rnn_param_kernel(%arg0: i32, %arg1: memref<8x256xf32, #tpu.memory_space<vmem>>, %arg2: memref<128x256xf32, #tpu.memory_space<vmem>>, %arg3: memref<2x128x128xf32, #tpu.memory_space<vmem>>, %arg4: memref<136x128xf32, #tpu.memory_space<vmem>>, %arg5: memref<8x256xf32, #tpu.memory_space<vmem>>) attributes {dimension_semantics = [#tpu.dimension_semantics<parallel>], iteration_bounds = array<i64: 1>, scalar_prefetch = 0 : i64, scratch_operands = 0 : i64, tpu.core_type = #tpu.core_type<tc>, window_params = [{transform_indices = @transform_0, window_bounds = array<i64: 8, 256>}, {pipeline_mode = #tpu.pipeline_mode<synchronous>, transform_indices = @transform_1, window_bounds = array<i64: 128, 256>}, {pipeline_mode = #tpu.pipeline_mode<synchronous>, transform_indices = @transform_2, window_bounds = array<i64: 2, 128, 128>}, {pipeline_mode = #tpu.pipeline_mode<synchronous>, transform_indices = @transform_3, window_bounds = array<i64: 136, 128>}, {transform_indices = @transform_4, window_bounds = array<i64: 8, 256>}]} {
    %c0 = arith.constant 0 : index
    %c0_0 = arith.constant 0 : index
    %0 = vector.load %arg1[%c0, %c0_0] : memref<8x256xf32, #tpu.memory_space<vmem>>, vector<8x256xf32>
    %1 = vector.extract_strided_slice %0 {offsets = [0, 0], sizes = [8, 128], strides = [1, 1]} : vector<8x256xf32> to vector<8x128xf32>
    %2 = vector.extract_strided_slice %0 {offsets = [0, 128], sizes = [8, 128], strides = [1, 1]} : vector<8x256xf32> to vector<8x128xf32>
    %c0_1 = arith.constant 0 : index
    %c0_2 = arith.constant 0 : index
    %3 = vector.load %arg2[%c0_1, %c0_2] : memref<128x256xf32, #tpu.memory_space<vmem>>, vector<128x256xf32>
    %cst = arith.constant dense<0.000000e+00> : vector<8x256xf32>
    %4 = tpu.matmul %1, %3, %cst {dimension_numbers = #tpu.dot_dimension_numbers<[1], [0], [0], [1], [0, 0, 1, 1], [], []>} : vector<8x128xf32>, vector<128x256xf32>, vector<8x256xf32> -> vector<8x256xf32>
    %c0_3 = arith.constant 0 : index
    %c0_4 = arith.constant 0 : index
    %c0_5 = arith.constant 0 : index
    %5 = vector.load %arg3[%c0_3, %c0_4, %c0_5] : memref<2x128x128xf32, #tpu.memory_space<vmem>>, vector<1x128x128xf32>
    %6 = vector.shape_cast %5 : vector<1x128x128xf32> to vector<128x128xf32>
    %cst_6 = arith.constant dense<0.000000e+00> : vector<8x128xf32>
    %7 = tpu.matmul %2, %6, %cst_6 {dimension_numbers = #tpu.dot_dimension_numbers<[1], [0], [0], [1], [0, 0, 1, 1], [], []>} : vector<8x128xf32>, vector<128x128xf32>, vector<8x128xf32> -> vector<8x128xf32>
    %8 = vector.extract_strided_slice %4 {offsets = [0, 0], sizes = [8, 128], strides = [1, 1]} : vector<8x256xf32> to vector<8x128xf32>
    %9 = arith.addf %7, %8 : vector<8x128xf32>
    %c1 = arith.constant 1 : index
    %c0_7 = arith.constant 0 : index
    %c0_8 = arith.constant 0 : index
    %10 = vector.load %arg3[%c1, %c0_7, %c0_8] : memref<2x128x128xf32, #tpu.memory_space<vmem>>, vector<1x128x128xf32>
    %11 = vector.shape_cast %10 : vector<1x128x128xf32> to vector<128x128xf32>
    %cst_9 = arith.constant dense<0.000000e+00> : vector<8x128xf32>
    %12 = tpu.matmul %9, %11, %cst_9 {dimension_numbers = #tpu.dot_dimension_numbers<[1], [0], [0], [1], [0, 0, 1, 1], [], []>} : vector<8x128xf32>, vector<128x128xf32>, vector<8x128xf32> -> vector<8x128xf32>
    %13 = vector.extract_strided_slice %4 {offsets = [0, 128], sizes = [8, 128], strides = [1, 1]} : vector<8x256xf32> to vector<8x128xf32>
    %14 = arith.addf %12, %13 : vector<8x128xf32>
    %c0_10 = arith.constant 0 : index
    %c0_11 = arith.constant 0 : index
    %15 = vector.load %arg4[%c0_10, %c0_11] : memref<136x128xf32, #tpu.memory_space<vmem>>, vector<128x128xf32>
    %cst_12 = arith.constant dense<0.000000e+00> : vector<8x128xf32>
    %16 = tpu.matmul %14, %15, %cst_12 {dimension_numbers = #tpu.dot_dimension_numbers<[1], [0], [0], [1], [0, 0, 1, 1], [], []>} : vector<8x128xf32>, vector<128x128xf32>, vector<8x128xf32> -> vector<8x128xf32>
    %c128 = arith.constant 128 : index
    %c0_13 = arith.constant 0 : index
    %17 = vector.load %arg4[%c128, %c0_13] : memref<136x128xf32, #tpu.memory_space<vmem>>, vector<1x128xf32>
    %18 = vector.broadcast %17 : vector<1x128xf32> to vector<8x128xf32>
    %19 = arith.addf %16, %18 : vector<8x128xf32>
    %cst_14 = arith.constant dense<0xFF800000> : vector<8xf32>
    %20 = vector.multi_reduction <maximumf>, %19, %cst_14 [1] : vector<8x128xf32> to vector<8xf32>
    %21 = vector.shape_cast %20 : vector<8xf32> to vector<8x1xf32>
    %22 = vector.broadcast %21 : vector<8x1xf32> to vector<8x128xf32>
    %23 = arith.subf %19, %22 : vector<8x128xf32>
    %24 = math.exp %23 : vector<8x128xf32>
    %cst_15 = arith.constant dense<0.000000e+00> : vector<8xf32>
    %25 = vector.multi_reduction <add>, %24, %cst_15 [1] : vector<8x128xf32> to vector<8xf32>
    %26 = vector.shape_cast %25 : vector<8xf32> to vector<8x1xf32>
    %27 = vector.broadcast %26 : vector<8x1xf32> to vector<8x128xf32>
    %28 = arith.divf %24, %27 : vector<8x128xf32>
    %c0_16 = arith.constant 0 : index
    %c0_17 = arith.constant 0 : index
    %29 = vector.load %arg5[%c0_16, %c0_17] : memref<8x256xf32, #tpu.memory_space<vmem>>, vector<8x128xf32>
    tpu.vector_store %arg5[%c0_16, %c0_17], %14 {strides = array<i32>} : memref<8x256xf32, #tpu.memory_space<vmem>>, vector<8x128xf32>,
    %c0_18 = arith.constant 0 : index
    %c128_19 = arith.constant 128 : index
    %30 = vector.load %arg5[%c0_18, %c128_19] : memref<8x256xf32, #tpu.memory_space<vmem>>, vector<8x128xf32>
    tpu.vector_store %arg5[%c0_18, %c128_19], %28 {strides = array<i32>} : memref<8x256xf32, #tpu.memory_space<vmem>>, vector<8x128xf32>,
    return
  }
  func.func @transform_0(%arg0: i32) -> (i32, i32) {
    %c0_i32 = arith.constant 0 : i32
    %c0_i32_0 = arith.constant 0 : i32
    return %arg0, %c0_i32 : i32, i32
  }
  func.func @transform_1(%arg0: i32) -> (i32, i32) {
    %c0_i32 = arith.constant 0 : i32
    %c0_i32_0 = arith.constant 0 : i32
    %c0_i32_1 = arith.constant 0 : i32
    return %c0_i32, %c0_i32_0 : i32, i32
  }
  func.func @transform_2(%arg0: i32) -> (i32, i32, i32) {
    %c0_i32 = arith.constant 0 : i32
    %c0_i32_0 = arith.constant 0 : i32
    %c0_i32_1 = arith.constant 0 : i32
    %c0_i32_2 = arith.constant 0 : i32
    return %c0_i32, %c0_i32_0, %c0_i32_1 : i32, i32, i32
  }
  func.func @transform_3(%arg0: i32) -> (i32, i32) {
    %c0_i32 = arith.constant 0 : i32
    %c0_i32_0 = arith.constant 0 : i32
    %c0_i32_1 = arith.constant 0 : i32
    return %c0_i32, %c0_i32_0 : i32, i32
  }
  func.func @transform_4(%arg0: i32) -> (i32, i32) {
    %c0_i32 = arith.constant 0 : i32
    %c0_i32_0 = arith.constant 0 : i32
    return %arg0, %c0_i32 : i32, i32
  }
}

</mosaic_0001>

<bundles_post_ra>
// kernel: rnn_parametrizer_forward.1
= control target key start
LH: loop header
LB: loop body
LE: loop exit
PB: predicated region body
PF: predicated region fallthrough
CT: control target
= control target key end

     0   :  { %s531_s2 = inlined_call_operand.vmem [shape: f32[2,128,128], index: 2, kind: input, shape index: {}]   ;;  %s532_s1 = inlined_call_operand.vmem [shape: f32[128,256], index: 1, kind: input, shape index: {}]   ;;  %s533_s0 = inlined_call_operand.vmem [shape: f32[8,256], index: 0, kind: input, shape index: {}]   ;;  %s534_s3 = inlined_call_operand.vmem [shape: f32[136,128], index: 3, kind: input, shape index: {}]   ;;  %s535_s4 = inlined_call_operand.vmem [shape: f32[8,256], index: 4, kind: output, shape index: {}]  }
   0x1   :  { %v106_v0 = vld [vmem:[%s531_s2 + $0x78] sm:$0xff]  ;;  %v105_v1 = vld [vmem:[%s531_s2 + $0x70] sm:$0xff]  ;;  %v47_v3 = vld [vmem:[%s532_s1 + $0xe0] sm:$0xff] }
   0x2   :  { %107 = vmatpush.msra.mxu2 %v106_v0  ;;  %v49_v2 = vld [vmem:[%s532_s1 + $0xf0] sm:$0xff]  ;;  %v104_v4 = vld [vmem:[%s531_s2 + $0x68] sm:$0xff]  ;;  %v103_v6 = vld [vmem:[%s531_s2 + $0x60] sm:$0xff] }
   0x3   :  { %51 = vmatpush.msra.mxu0 %v49_v2  ;;  %v45_v5 = vld [vmem:[%s532_s1 + $0xd0] sm:$0xff]  ;;  %v43_v7 = vld [vmem:[%s532_s1 + $0xc0] sm:$0xff]  ;;  %v102_v8 = vld [vmem:[%s531_s2 + $0x58] sm:$0xff] }
   0x4   :  { %108 = vmatpush.msra.mxu2 %v105_v1  ;;  %v41_v9 = vld [vmem:[%s532_s1 + $0xb0] sm:$0xff]  ;;  %v39_v11 = vld [vmem:[%s532_s1 + $0xa0] sm:$0xff]  ;;  %v100_v12 = vld [vmem:[%s531_s2 + $0x48] sm:$0xff] }
   0x5   :  { %52 = vmatpush.msra.mxu0 %v47_v3  ;;  %v101_v10 = vld [vmem:[%s531_s2 + $0x50] sm:$0xff]  ;;  %v245_v14 = vld [vmem:[%s531_s2 + $0xf8] sm:$0xff]  ;;  %v99_v16 = vld [vmem:[%s531_s2 + $0x40] sm:$0xff] }
   0x6   :  { %109 = vmatpush.msra.mxu2 %v104_v4  ;;  %v37_v13 = vld [vmem:[%s532_s1 + $0x90] sm:$0xff]  ;;  %144 = vmatpush.msra.mxu3 %v245_v14  ;;  %v50_v17 = vld [vmem:[%s532_s1 + $0xf8] sm:$0xff]  ;;  %v35_v18 = vld [vmem:[%s532_s1 + $0x80] sm:$0xff] }
   0x7   :  { %53 = vmatpush.msra.mxu0 %v45_v5  ;;  %v244_v15 = vld [vmem:[%s531_s2 + $0xf0] sm:$0xff]  ;;  %v243_v19 = vld [vmem:[%s531_s2 + $0xe8] sm:$0xff]  ;;  %71 = vmatpush.msra.mxu1 %v50_v17  ;;  %v98_v21 = vld [vmem:[%s531_s2 + $0x38] sm:$0xff] }
   0x8   :  { %110 = vmatpush.msra.mxu2 %v103_v6  ;;  %v48_v20 = vld [vmem:[%s532_s1 + $0xe8] sm:$0xff]  ;;  %145 = vmatpush.msra.mxu3 %v244_v15  ;;  %v46_v22 = vld [vmem:[%s532_s1 + $0xd8] sm:$0xff]  ;;  %v33_v23 = vld [vmem:[%s532_s1 + $0x70] sm:$0xff] }
   0x9   :  { %54 = vmatpush.msra.mxu0 %v43_v7  ;;  %v242_v24 = vld [vmem:[%s531_s2 + $0xe0] sm:$0xff]  ;;  %72 = vmatpush.msra.mxu1 %v48_v20  ;;  %v97_v25 = vld [vmem:[%s531_s2 + $0x30] sm:$0xff]  ;;  %v44_v26 = vld [vmem:[%s532_s1 + $0xc8] sm:$0xff] }
   0xa   :  { %111 = vmatpush.msra.mxu2 %v102_v8  ;;  %146 = vmatpush.msra.mxu3 %v243_v19  ;;  %v31_v27 = vld [vmem:[%s532_s1 + $0x60] sm:$0xff]  ;;  %v241_v28 = vld [vmem:[%s531_s2 + $0xd8] sm:$0xff]  ;;  %v96_v29 = vld [vmem:[%s531_s2 + $0x28] sm:$0xff] }
   0xb   :  { %55 = vmatpush.msra.mxu0 %v41_v9  ;;  %73 = vmatpush.msra.mxu1 %v46_v22  ;;  %v42_v30 = vld [vmem:[%s532_s1 + $0xb8] sm:$0xff]  ;;  %v29_v31 = vld [vmem:[%s532_s1 + $0x50] sm:$0xff]  ;;  %v95_v33 = vld [vmem:[%s531_s2 + $0x20] sm:$0xff] }
   0xc   :  { %112 = vmatpush.msra.mxu2 %v101_v10  ;;  %147 = vmatpush.msra.mxu3 %v242_v24  ;;  %v240_v32 = vld [vmem:[%s531_s2 + $0xd0] sm:$0xff]  ;;  %v40_v34 = vld [vmem:[%s532_s1 + $0xa8] sm:$0xff]  ;;  %v27_v35 = vld [vmem:[%s532_s1 + $0x40] sm:$0xff] }
   0xd   :  { %56 = vmatpush.msra.mxu0 %v39_v11  ;;  %74 = vmatpush.msra.mxu1 %v44_v26  ;;  %v239_v36 = vld [vmem:[%s531_s2 + $0xc8] sm:$0xff]  ;;  %v94_v37 = vld [vmem:[%s531_s2 + $0x18] sm:$0xff]  ;;  %v25_v39 = vld [vmem:[%s532_s1 + $0x30] sm:$0xff] }
   0xe   :  { %113 = vmatpush.msra.mxu2 %v100_v12  ;;  %148 = vmatpush.msra.mxu3 %v241_v28  ;;  %v38_v38 = vld [vmem:[%s532_s1 + $0x98] sm:$0xff]  ;;  %v238_v40 = vld [vmem:[%s531_s2 + $0xc0] sm:$0xff]  ;;  %v93_v41 = vld [vmem:[%s531_s2 + $0x10] sm:$0xff] }
   0xf   :  { %57 = vmatpush.msra.mxu0 %v37_v13  ;;  %75 = vmatpush.msra.mxu1 %v42_v30  ;;  %v36_v42 = vld [vmem:[%s532_s1 + $0x88] sm:$0xff]  ;;  %v23_v43 = vld [vmem:[%s532_s1 + $0x20] sm:$0xff]  ;;  %v237_v44 = vld [vmem:[%s531_s2 + $0xb8] sm:$0xff] }
  0x10   :  { %114 = vmatpush.msra.mxu2 %v99_v16  ;;  %149 = vmatpush.msra.mxu3 %v240_v32  ;;  %v92_v45 = vld [vmem:[%s531_s2 + $0x8] sm:$0xff]  ;;  %v34_v46 = vld [vmem:[%s532_s1 + $0x78] sm:$0xff]  ;;  %v21_v47 = vld [vmem:[%s532_s1 + $0x10] sm:$0xff] }
  0x11   :  { %58 = vmatpush.msra.mxu0 %v35_v18  ;;  %76 = vmatpush.msra.mxu1 %v40_v34  ;;  %v236_v48 = vld [vmem:[%s531_s2 + $0xb0] sm:$0xff]  ;;  %v91_v49 = vld [vmem:[%s531_s2] sm:$0xff]  ;;  %v32_v50 = vld [vmem:[%s532_s1 + $0x68] sm:$0xff] }
  0x12   :  { %115 = vmatpush.msra.mxu2 %v98_v21  ;;  %150 = vmatpush.msra.mxu3 %v239_v36  ;;  %v18_v51 = vld [vmem:[%s533_s0 + $0x8] sm:$0xff]  ;;  %v19_v52 = vld [vmem:[%s532_s1] sm:$0xff]  ;;  %v30_v55 = vld [vmem:[%s532_s1 + $0x58] sm:$0xff] }
  0x13   :  { %59 = vmatpush.msra.mxu0 %v33_v23  ;;  %77 = vmatpush.msra.mxu1 %v38_v38  ;;  %v17_v53 = vld [vmem:[%s533_s0] sm:$0xff]  ;;  %v235_v54 = vld [vmem:[%s531_s2 + $0xa8] sm:$0xff]  ;;  %v233_v57 = vld [vmem:[%s531_s2 + $0x98] sm:$0xff] }
  0x14   :  { %116 = vmatpush.msra.mxu2 %v97_v25  ;;  %151 = vmatpush.msra.mxu3 %v238_v40  ;;  %v234_v56 = vld [vmem:[%s531_s2 + $0xa0] sm:$0xff]  ;;  %v232_v58 = vld [vmem:[%s531_s2 + $0x90] sm:$0xff]  ;;  %v28_v59 = vld [vmem:[%s532_s1 + $0x48] sm:$0xff] }
  0x15   :  { %60 = vmatpush.msra.mxu0 %v31_v27  ;;  %78 = vmatpush.msra.mxu1 %v36_v42  ;;  %v231_v60 = vld [vmem:[%s531_s2 + $0x88] sm:$0xff]  ;;  %v26_v61 = vld [vmem:[%s532_s1 + $0x38] sm:$0xff]  ;;  %v230_v62 = vld [vmem:[%s531_s2 + $0x80] sm:$0xff] }
  0x16   :  { %117 = vmatpush.msra.mxu2 %v96_v29  ;;  %152 = vmatpush.msra.mxu3 %v237_v44  ;;  %v24_v63 = vld [vmem:[%s532_s1 + $0x28] sm:$0xff]  ;;  %v22_v0 = vld [vmem:[%s532_s1 + $0x18] sm:$0xff]  ;;  %v178_v2 = vld [vmem:[%s534_s3 + $0x70] sm:$0xff] }
  0x17   :  { %61 = vmatpush.msra.mxu0 %v29_v31  ;;  %79 = vmatpush.msra.mxu1 %v34_v46  ;;  %v179_v1 = vld [vmem:[%s534_s3 + $0x78] sm:$0xff]  ;;  %v20_v3 = vld [vmem:[%s532_s1 + $0x8] sm:$0xff]  ;;  %v176_v5 = vld [vmem:[%s534_s3 + $0x60] sm:$0xff] }
  0x18   :  { %118 = vmatpush.msra.mxu2 %v95_v33  ;;  %153 = vmatpush.msra.mxu3 %v236_v48  ;;  %v177_v4 = vld [vmem:[%s534_s3 + $0x68] sm:$0xff]  ;;  %v175_v6 = vld [vmem:[%s534_s3 + $0x58] sm:$0xff]  ;;  %v174_v7 = vld [vmem:[%s534_s3 + $0x50] sm:$0xff] }
  0x19   :  { %62 = vmatpush.msra.mxu0 %v27_v35  ;;  %80 = vmatpush.msra.mxu1 %v32_v50  ;;  %v173_v8 = vld [vmem:[%s534_s3 + $0x48] sm:$0xff]  ;;  %v172_v9 = vld [vmem:[%s534_s3 + $0x40] sm:$0xff]  ;;  %v171_v10 = vld [vmem:[%s534_s3 + $0x38] sm:$0xff] }
  0x1a   :  { %119 = vmatpush.msra.mxu2 %v94_v37  ;;  %154 = vmatpush.msra.mxu3 %v235_v54  ;;  %v170_v11 = vld [vmem:[%s534_s3 + $0x30] sm:$0xff]  ;;  %v169_v12 = vld [vmem:[%s534_s3 + $0x28] sm:$0xff]  ;;  %v168_v13 = vld [vmem:[%s534_s3 + $0x20] sm:$0xff] }
  0x1b   :  { %63 = vmatpush.msra.mxu0 %v25_v39  ;;  %81 = vmatpush.msra.mxu1 %v30_v55  ;;  %v167_v14 = vld [vmem:[%s534_s3 + $0x18] sm:$0xff]  ;;  %v166_v15 = vld [vmem:[%s534_s3 + $0x10] sm:$0xff]  ;;  %v165_v19 = vld [vmem:[%s534_s3 + $0x8] sm:$0xff] }
  0x1c   :  { %120 = vmatpush.msra.mxu2 %v93_v41  ;;  %155 = vmatpush.msra.mxu3 %v234_v56  ;;  %v164_v20 = vld [vmem:[%s534_s3] sm:$0xff] }
  0x1d   :  { %64 = vmatpush.msra.mxu0 %v23_v43  ;;  %82 = vmatpush.msra.mxu1 %v28_v59  ;;  %v246_v24 = vld [vmem:[%s534_s3 + $0x80] ss:$0 sm:$0xff] }
  0x1e   :  { %121 = vmatpush.msra.mxu2 %v92_v45  ;;  %156 = vmatpush.msra.mxu3 %v233_v57 }
  0x1f   :  { %65 = vmatpush.msra.mxu0 %v21_v47  ;;  %83 = vmatpush.msra.mxu1 %v26_v61 }
  0x20   :  { %122 = vmatpush.msra.mxu2 %v91_v49  ;;  %157 = vmatpush.msra.mxu3 %v232_v58 }
  0x21   :  { %123 = vmatmul.f32.vlgmr.msra.gmra.mxu2 %v18_v51  ;;  %66 = vmatpush.msra.mxu0 %v19_v52 }
  0x22   :  { %67 = vmatmul.f32.vlgmr.msra.gmra.mxu0 %v17_v53  ;;  %158 = vmatpush.msra.mxu3 %v231_v60 }
  0x23   :  { %84 = vmatpush.msra.mxu1 %v24_v63  ;;  %182 = vmatpush.msrb.mxu0 %v179_v1 }
  0x24   :  { %159 = vmatpush.msra.mxu3 %v230_v62 }
  0x25   :  { %85 = vmatpush.msra.mxu1 %v22_v0  ;;  %183 = vmatpush.msrb.mxu0 %v178_v2 }
  0x27   :  { %86 = vmatpush.msra.mxu1 %v20_v3  ;;  %184 = vmatpush.msrb.mxu0 %v177_v4 }
  0x28   :  { %87 = vmatmul.f32.vlgmr.msra.gmra.mxu1 %v17_v53 }
  0x29   :  { %185 = vmatpush.msrb.mxu0 %v176_v5 }
  0x2b   :  { %186 = vmatpush.msrb.mxu0 %v175_v6 }
  0x2d   :  { %187 = vmatpush.msrb.mxu0 %v174_v7 }
  0x2f   :  { %188 = vmatpush.msrb.mxu0 %v173_v8 }
  0x31   :  { %189 = vmatpush.msrb.mxu0 %v172_v9 }
  0x33   :  { %190 = vmatpush.msrb.mxu0 %v171_v10 }
  0x35   :  { %191 = vmatpush.msrb.mxu0 %v170_v11 }
  0x37   :  { %192 = vmatpush.msrb.mxu0 %v169_v12 }
  0x39   :  { %193 = vmatpush.msrb.mxu0 %v168_v13 }
  0x3b   :  { %194 = vmatpush.msrb.mxu0 %v167_v14 }
  0x3d   :  { %195 = vmatpush.msrb.mxu0 %v166_v15 }
  0x3f   :  { %196 = vmatpush.msrb.mxu0 %v165_v19 }
  0x41   :  { %197 = vmatpush.msrb.mxu0 %v164_v20 }
  0x9f   :  { %v68_v16 = vpop.f32.mrf.mxu0 }
  0xa4   :  { %v124_v17 = vpop.f32.mrf.mxu2 }
  0xa5   :  { %v125_v18 = vadd.f32 %v124_v17, %v68_v16  ;;  %v88_v21 = vpop.f32.mrf.mxu1 }
  0xa7   :  { %160 = vmatmul.f32.vlgmr.msra.gmra.mxu3 %v125_v18 }
 0x12a   :  { %v161_v22 = vpop.f32.mrf.mxu3 }
 0x12b   :  { %v162_v23 = vadd.f32 %v161_v22, %v88_v21 }
 0x12d   :  { %224 = vst [vmem:[%s535_s4] sm:$0xff] %v162_v23  ;;  %198 = vmatmul.f32.vlgmr.msrb.gmra.mxu0 %v162_v23 }
 0x1aa   :  { %v199_v25 = vpop.f32.mrf.mxu0 }
 0x1ab   :  { %v200_v26 = vadd.f32 %v246_v24, %v199_v25 }
 0x1ad   :  { %202 = vmax.xlane.f32.xlu0 %v200_v26 }
 0x220   :  { %v203_v27 = vpop.xlane.xlu0 %202 }
 0x221   :  { %v204_v28 = vsub.f32 %v200_v26, %v203_v27 }
 0x223   :  { %v205_v29 = vmul.f32 1.442695, %v204_v28 }
 0x225   :  { %247 = vpow2.f32 %v205_v29 }
 0x22b   :  { %v248_v30 = vpop.eup %247 }
 0x22c   :  { %207 = vadd.xlane.f32.xlu0 %v248_v30 }
 0x29f   :  { %v208_v31 = vpop.xlane.xlu0 %207 }
 0x2a0   :  { %249 = vrcp.f32 %v208_v31  ;;  %v220_v35 = vand.u32 2147483648, %v208_v31  ;;  %v218_v37 = vand.u32 2147483647, %v208_v31  ;;  %vm214_vm1 = vweird.f32 %v208_v31 }
 0x2a2   :  { %v221_v39 = vor.u32 1.1754944e-38, %v220_v35  ;;  %vm219_vm3 = vcmp.eq.f32.partialorder %v218_v37, 8.507059e+37 }
 0x2a6   :  { %v250_v32 = vpop.eup %249 }
 0x2a7   :  { %v210_v33 = vmul.f32 %v250_v32, %v208_v31  ;;  %vm215_vm0 = vweird.f32 %v250_v32 }
 0x2a8   :  { %vm216_vm2 = vmor %vm214_vm1, %vm215_vm0 }
 0x2a9   :  { %v211_v34 = vsub.f32 1.0, %v210_v33 }
 0x2ab   :  { %v212_v36 = vmul.f32 %v250_v32, %v211_v34 }
 0x2ad   :  { %v213_v38 = vadd.f32 %v250_v32, %v212_v36 }
 0x2af   :  { %v217_v40 = vsel %vm216_vm2, %v250_v32, %v213_v38 }
 0x2b0   :  { %v222_v41 = vsel %vm219_vm3, %v221_v39, %v217_v40 }
 0x2b1   :  { %v223_v42 = vmul.f32 %v248_v30, %v222_v41 }
 0x2b3   :  { %225 = vst [vmem:[%s535_s4 + $0x8] sm:$0xff] %v223_v42 }

</bundles_post_ra>
